<compile_context>
chip_gen: v5e
topology: v5e:2x2
jax: 0.10.0
libtpu: 0.0.40
codegen_flags: <defaults>
</compile_context>

<pallas_src>
import functools
import math

import jax
import jax.numpy as jnp
from jax.experimental import pallas as pl
from jax.experimental.pallas import tpu as pltpu

_VMEM_LIMIT = 32 * 1024 * 1024  # conservative cap: fits v7x (64 MiB) and v5e/v6e


def _round_up(x, m):
    return ((x + m - 1) // m) * m


def _choose_tile(dim, target, align):
    """Return (tile, padded_dim): tile divides padded_dim, padded_dim >= dim.

    Prefers an aligned divisor of `dim`; otherwise pads `dim` up to a tile multiple
    (instead of falling back to the full dimension, which blows VMEM for large vocabs).
    """
    if dim <= target:
        return dim, dim
    t = (target // align) * align
    while t >= align:
        if dim % t == 0:
            return t, dim
        t -= align
    t = (target // align) * align
    return t, _round_up(dim, t)


def _pick_divisor(dim, target, align):
    """Largest aligned tile <= target dividing dim, else the full dim (for seq tiling)."""
    if dim <= target:
        return dim
    t = (target // align) * align
    while t >= align:
        if dim % t == 0:
            return t
        t -= align
    return dim  # TODO(synk): pad S + mask for pathological sequence lengths


# ----------------------------- tiled linear (matmul + bias [+ ReLU]) -----------------------------


def _linear_kernel(x_ref, w_ref, b_ref, o_ref, acc_ref, *, relu):
    k = pl.program_id(2)

    @pl.when(k == 0)
    def _init():
        acc_ref[...] = jnp.zeros_like(acc_ref)

    acc_ref[...] += jnp.dot(
        x_ref[...], w_ref[...], preferred_element_type=jnp.float32
    )

    @pl.when(k == pl.num_programs(2) - 1)
    def _finalize():
        y = acc_ref[...] + b_ref[...]
        if relu:
            y = jnp.maximum(y, 0.0)
        o_ref[...] = y.astype(o_ref.dtype)


def linear(x, w, b, *, relu=False, out_dtype=jnp.bfloat16, tm=512, tn=512, tk=512):
    """y = x @ w + b (optional ReLU).  x: [M,K] bf16, w: [K,N] bf16, b: [N] f32.

    bf16 MXU operands, f32 VMEM accumulation; output emitted directly in `out_dtype`.
    Non-divisible dims are zero-padded to the tile multiple and sliced back.
    """
    M, K = x.shape
    N = w.shape[1]
    tm, Mp = _choose_tile(M, tm, 16)    # bf16 sublane packing -> 16-row alignment
    tn, Np = _choose_tile(N, tn, 128)
    tk, Kp = _choose_tile(K, tk, 128)

    xb = x if x.dtype == jnp.bfloat16 else x.astype(jnp.bfloat16)   # no-op in steady state
    wb = w if w.dtype == jnp.bfloat16 else w.astype(jnp.bfloat16)
    b2 = b.reshape(1, N).astype(jnp.float32)
    if Mp != M or Kp != K:
        xb = jnp.pad(xb, ((0, Mp - M), (0, Kp - K)))
    if Kp != K or Np != N:
        wb = jnp.pad(wb, ((0, Kp - K), (0, Np - N)))
    if Np != N:
        b2 = jnp.pad(b2, ((0, 0), (0, Np - N)))

    grid = (Mp // tm, Np // tn, Kp // tk)
    cost = pl.CostEstimate(
        flops=2 * Mp * Np * Kp,
        transcendentals=0,
        bytes_accessed=2 * (Mp * Kp + Kp * Np) + 2 * Mp * Np + 4 * Np,
    )
    out = pl.pallas_call(
        functools.partial(_linear_kernel, relu=relu),
        grid_spec=pltpu.PrefetchScalarGridSpec(
            num_scalar_prefetch=0,
            grid=grid,
            in_specs=[
                pl.BlockSpec((tm, tk), lambda i, j, k: (i, k)),
                pl.BlockSpec((tk, tn), lambda i, j, k: (k, j)),
                pl.BlockSpec((1, tn), lambda i, j, k: (0, j)),
            ],
            out_specs=pl.BlockSpec((tm, tn), lambda i, j, k: (i, j)),
            scratch_shapes=[pltpu.VMEM((tm, tn), jnp.float32)],
        ),
        out_shape=jax.ShapeDtypeStruct((Mp, Np), out_dtype),
        compiler_params=pltpu.CompilerParams(
            dimension_semantics=("parallel", "parallel", "arbitrary"),
            vmem_limit_bytes=_VMEM_LIMIT,
        ),
        cost_estimate=cost,
    )(xb, wb, b2)
    if Mp != M or Np != N:
        out = out[:M, :N]
    return out


# ----------------------------- fused residual-add + LayerNorm (row-tiled) -----------------------------


def _add_ln_kernel(x_ref, r_ref, g_ref, b_ref, o_ref):
    x = x_ref[...].astype(jnp.float32) + r_ref[...].astype(jnp.float32)
    mu = jnp.mean(x, axis=-1, keepdims=True)
    var = jnp.mean(jnp.square(x - mu), axis=-1, keepdims=True)
    y = (x - mu) * jax.lax.rsqrt(var + 1e-5) * g_ref[...] + b_ref[...]
    o_ref[...] = y.astype(o_ref.dtype)


def add_layer_norm(x, r, g, b, *, tm=256, out_dtype=jnp.bfloat16):
    """LayerNorm(x + r); x/r: [M, D] bf16, g/b: [D] f32.  f32 statistics, bf16 output."""
    M, D = x.shape
    tm, Mp = _choose_tile(M, tm, 16)
    xp, rp = x, r
    if Mp != M:
        xp = jnp.pad(x, ((0, Mp - M), (0, 0)))
        rp = jnp.pad(r, ((0, Mp - M), (0, 0)))
    out = pl.pallas_call(
        _add_ln_kernel,
        grid_spec=pltpu.PrefetchScalarGridSpec(
            num_scalar_prefetch=0,
            grid=(Mp // tm,),
            in_specs=[
                pl.BlockSpec((tm, D), lambda i: (i, 0)),
                pl.BlockSpec((tm, D), lambda i: (i, 0)),
                pl.BlockSpec((1, D), lambda i: (0, 0)),
                pl.BlockSpec((1, D), lambda i: (0, 0)),
            ],
            out_specs=pl.BlockSpec((tm, D), lambda i: (i, 0)),
        ),
        out_shape=jax.ShapeDtypeStruct((Mp, D), out_dtype),
        compiler_params=pltpu.CompilerParams(
            dimension_semantics=("parallel",),
            vmem_limit_bytes=_VMEM_LIMIT,
        ),
    )(xp, rp, g.reshape(1, D).astype(jnp.float32), b.reshape(1, D).astype(jnp.float32))
    return out[:M] if Mp != M else out


# ----------------------------- flash-style causal attention (heads inside kernel) -----------------------------


def _flash_attn_kernel(pad_ref, q_ref, k_ref, v_ref, o_ref,
                       m_sc, l_sc, acc_sc, *, scale, tq, tk, num_heads):
    qi = pl.program_id(1)
    ki = pl.program_id(2)

    @pl.when(ki == 0)
    def _init():
        m_sc[...] = jnp.full_like(m_sc, -jnp.inf)
        l_sc[...] = jnp.zeros_like(l_sc)
        acc_sc[...] = jnp.zeros_like(acc_sc)

    # Skip KV tiles that are entirely in the (causal) future of this Q tile.
    # (their DMAs are also suppressed: the K/V index_map clamps to the last needed block)
    @pl.when(ki * tk <= qi * tq + (tq - 1))
    def _compute():
        pad = pad_ref[0]                                           # [1, tk] additive key-pad mask
        q_pos = qi * tq + jax.lax.broadcasted_iota(jnp.int32, (tq, tk), 0)
        k_pos = ki * tk + jax.lax.broadcasted_iota(jnp.int32, (tq, tk), 1)
        causal = q_pos >= k_pos
        for h in range(num_heads):                                  # static unroll over heads
            q = q_ref[0, h]                                         # [tq, Dh] bf16
            k = k_ref[0, h]                                         # [tk, Dh] bf16
            v = v_ref[0, h]                                         # [tk, Dh] bf16
            s = jax.lax.dot_general(
                q, k, (((1,), (1,)), ((), ())),
                preferred_element_type=jnp.float32) * scale         # [tq, tk] f32
            s = jnp.where(causal, s + pad, jnp.float32(-1e9))
            m_prev = m_sc[h]                                        # [tq, 1]
            m_new = jnp.maximum(m_prev, jnp.max(s, axis=-1, keepdims=True))
            alpha = jnp.exp(m_prev - m_new)
            p = jnp.exp(s - m_new)                                  # [tq, tk] f32
            l_sc[h] = alpha * l_sc[h] + jnp.sum(p, axis=-1, keepdims=True)
            acc_sc[h] = alpha * acc_sc[h] + jnp.dot(
                p.astype(v.dtype), v, preferred_element_type=jnp.float32)
            m_sc[h] = m_new

    @pl.when(ki == pl.num_programs(2) - 1)
    def _finalize():
        # Lane-dense [tq, E] output block (heads concatenated along the lane dim).
        outs = []
        for h in range(num_heads):
            outs.append(acc_sc[h] * pl.reciprocal(l_sc[h], approx=True))
        o_ref[0] = jnp.concatenate(outs, axis=-1).astype(o_ref.dtype)


def attention(q, k, v, pad_add, *, tq=256, tk=512):
    """q/k/v: [B, H, S, Dh] bf16, pad_add: [B, 1, S] f32 additive (0 / -1e9).

    Returns the attention context as a lane-dense [B, S, H*Dh] bf16 tensor
    (head h occupies columns h*Dh : (h+1)*Dh), ready for the output projection.
    """
    B, H, S, Dh = q.shape
    E = H * Dh
    tq = _pick_divisor(S, tq, 16)
    tk = _pick_divisor(S, tk, 128)
    scale = 1.0 / math.sqrt(Dh)

    def _kv_map(b, qi, ki):
        last = (qi * tq + (tq - 1)) // tk           # last causally-needed KV block
        return (b, 0, jnp.minimum(ki, last), 0)     # clamp -> no DMA for skipped tiles

    def _pad_map(b, qi, ki):
        last = (qi * tq + (tq - 1)) // tk
        return (b, 0, jnp.minimum(ki, last))

    kern = functools.partial(_flash_attn_kernel, scale=scale, tq=tq, tk=tk, num_heads=H)
    return pl.pallas_call(
        kern,
        grid_spec=pltpu.PrefetchScalarGridSpec(
            num_scalar_prefetch=0,
            grid=(B, S // tq, S // tk),
            in_specs=[
                pl.BlockSpec((1, 1, tk), _pad_map),
                pl.BlockSpec((1, H, tq, Dh), lambda b, qi, ki: (b, 0, qi, 0)),
                pl.BlockSpec((1, H, tk, Dh), _kv_map),
                pl.BlockSpec((1, H, tk, Dh), _kv_map),
            ],
            out_specs=pl.BlockSpec((1, tq, E), lambda b, qi, ki: (b, qi, 0)),
            scratch_shapes=[
                pltpu.VMEM((H, tq, 1), jnp.float32),   # running max m (per head)
                pltpu.VMEM((H, tq, 1), jnp.float32),   # running sum l (per head)
                pltpu.VMEM((H, tq, Dh), jnp.float32),  # output accumulator (per head)
            ],
        ),
        out_shape=jax.ShapeDtypeStruct((B, S, E), jnp.bfloat16),
        compiler_params=pltpu.CompilerParams(
            dimension_semantics=("parallel", "parallel", "arbitrary"),
            vmem_limit_bytes=_VMEM_LIMIT,
        ),
    )(pad_add, q, k, v)


# ----------------------------- model (glue) -----------------------------


def sinusoidal_pos_encoding(seq_len, dim):
    pos = jnp.arange(seq_len, dtype=jnp.float32)[:, None]
    i = jnp.arange(dim // 2, dtype=jnp.float32)[None, :]
    angle = pos / jnp.power(10000.0, 2.0 * i / dim)
    pe = jnp.zeros((seq_len, dim), dtype=jnp.float32)
    pe = pe.at[:, 0::2].set(jnp.sin(angle))
    pe = pe.at[:, 1::2].set(jnp.cos(angle))
    return pe


def init_params(key, vocab_size, embed_dim, num_heads, num_layers):
    """Weight matrices are stored in bf16 ONCE here (no per-call casts); biases/LN in f32."""
    ffn_dim = 4 * embed_dim
    scale = 0.02

    def nrm(k, shape):
        return (scale * jax.random.normal(k, shape, dtype=jnp.float32)).astype(jnp.bfloat16)

    keys = iter(jax.random.split(key, 2 + num_layers * 4))
    params = {
        "embedding": scale * jax.random.normal(next(keys), (vocab_size, embed_dim), jnp.float32),
        "layers": [],
        "out_w": nrm(next(keys), (embed_dim, vocab_size)),
        "out_b": jnp.zeros((vocab_size,), jnp.float32),
    }
    for _ in range(num_layers):
        layer = {
            # fused QKV projection: [E, 3E] = [wq | wk | wv]
            "wqkv": nrm(next(keys), (embed_dim, 3 * embed_dim)),
            "bqkv": jnp.zeros((3 * embed_dim,), jnp.float32),
            "wo": nrm(next(keys), (embed_dim, embed_dim)),
            "bo": jnp.zeros((embed_dim,), jnp.float32),
            "ln1_g": jnp.ones((embed_dim,), jnp.float32),
            "ln1_b": jnp.zeros((embed_dim,), jnp.float32),
            "ln2_g": jnp.ones((embed_dim,), jnp.float32),
            "ln2_b": jnp.zeros((embed_dim,), jnp.float32),
            "w_ff1": nrm(next(keys), (embed_dim, ffn_dim)),
            "b_ff1": jnp.zeros((ffn_dim,), jnp.float32),
            "w_ff2": nrm(next(keys), (ffn_dim, embed_dim)),
            "b_ff2": jnp.zeros((embed_dim,), jnp.float32),
        }
        params["layers"].append(layer)
    return params


def decoder_layer(p, h, pad_add, num_heads):
    B, S, E = h.shape
    Dh = E // num_heads
    h2 = h.reshape(B * S, E)                                   # bf16

    # Fused QKV projection (single tiled Pallas matmul), bf16 output
    qkv = linear(h2, p["wqkv"], p["bqkv"])                     # [B*S, 3E] bf16
    # TODO(synk): one remaining bf16 HBM round trip; removing it (linear writing a
    # [3,B,H,S,Dh]-layout output) requires Dh to be 128-aligned.
    qkv = qkv.reshape(B, S, 3, num_heads, Dh).transpose(2, 0, 3, 1, 4)  # [3, B, H, S, Dh]
    q, k, v = qkv[0], qkv[1], qkv[2]

    # Flash-style causal attention: lane-dense [B, S, E] output, no ctx transpose needed
    ctx = attention(q, k, v, pad_add)                          # [B, S, E] bf16
    attn_out = linear(ctx.reshape(B * S, E), p["wo"], p["bo"])  # [B*S, E] bf16

    # Post-LN residual blocks; residual add fused into the LayerNorm kernel.
    # Dropout = identity (eval mode).
    h2 = add_layer_norm(h2, attn_out, p["ln1_g"], p["ln1_b"])  # bf16

    ff = linear(h2, p["w_ff1"], p["b_ff1"], relu=True)         # bf16
    ff = linear(ff, p["w_ff2"], p["b_ff2"])                    # bf16
    h2 = add_layer_norm(h2, ff, p["ln2_g"], p["ln2_b"])        # bf16
    return h2.reshape(B, S, E)


def model_llm(params, x, padding_mask, *, num_heads):
    """x: [B, S] int32 token ids, padding_mask: [B, S] bool (True = pad). Returns f32 logits."""
    B, S = x.shape
    E = params["embedding"].shape[1]
    V = params["out_w"].shape[1]

    # Embedding + positional encoding (glue, f32), cast to bf16 once
    h = jnp.take(params["embedding"], x, axis=0)               # [B, S, E] f32
    h = (h + sinusoidal_pos_encoding(S, E)[None]).astype(jnp.bfloat16)

    # Additive key-padding mask shared across heads/query rows: [B, 1, S]
    # (causal part is generated inside the attention kernel — no [B*H,S,S] mask in HBM).
    # NOTE: fully-masked (padded) query rows produce a uniform average over masked keys;
    # finite but meaningless — padded rows are discarded downstream.
    pad_add = jnp.where(padding_mask, jnp.float32(-1e9), jnp.float32(0.0))[:, None, :]

    for p in params["layers"]:
        h = decoder_layer(p, h, pad_add, num_heads)

    # Final vocab projection (tiled Pallas matmul); vocab (N) tiling gives the parallel split.
    logits = linear(h.reshape(B * S, E), params["out_w"], params["out_b"],
                    out_dtype=jnp.float32)
    return logits.reshape(B, S, V)


# ----------------------------- main -----------------------------

if __name__ == "__main__":
    B, S = 2, 8
    vocab_size, embed_dim, num_heads, num_layers = 64, 32, 4, 2
    dropout = 0.1  # eval mode -> identity

    root = jax.random.PRNGKey(0)
    k_tok, k_par = jax.random.split(root)

    x = jax.random.randint(k_tok, (B, S), 0, vocab_size, dtype=jnp.int32)
    # last two positions of each sequence are padding
    padding_mask = jnp.zeros((B, S), dtype=bool).at[:, -2:].set(True)

    params = init_params(k_par, vocab_size, embed_dim, num_heads, num_layers)

    logits = model_llm(params, x, padding_mask, num_heads=num_heads)
    logits = jax.block_until_ready(logits)

    assert logits.shape == (B, S, vocab_size), logits.shape
    assert logits.dtype == jnp.float32
    assert bool(jnp.all(jnp.isfinite(logits)))
    print("KERNEL_OK")
</pallas_src>

<mosaic_0001>
module attributes {stable_mosaic.version = 11 : i64} {
  func.func @_linear_kernel(%arg0: i32, %arg1: i32, %arg2: i32, %arg3: memref<16x32xbf16, #tpu.memory_space<vmem>>, %arg4: memref<32x96xbf16, #tpu.memory_space<vmem>>, %arg5: memref<1x96xf32, #tpu.memory_space<vmem>>, %arg6: memref<16x96xbf16, #tpu.memory_space<vmem>>, %arg7: memref<16x96xf32, #tpu.memory_space<vmem>>) attributes {dimension_semantics = [#tpu.dimension_semantics<parallel>, #tpu.dimension_semantics<parallel>, #tpu.dimension_semantics<arbitrary>], iteration_bounds = array<i64: 1, 1, 1>, scalar_prefetch = 0 : i64, scratch_operands = 1 : i64, tpu.core_type = #tpu.core_type<tc>, window_params = [{transform_indices = @transform_0, window_bounds = array<i64: 16, 32>}, {transform_indices = @transform_1, window_bounds = array<i64: 32, 96>}, {transform_indices = @transform_2, window_bounds = array<i64: 1, 96>}, {transform_indices = @transform_3, window_bounds = array<i64: 16, 96>}]} {
    %c0_i32 = arith.constant 0 : i32
    %0 = arith.cmpi eq, %arg2, %c0_i32 : i32
    %1 = arith.extui %0 : i1 to i32
    %c0_i32_0 = arith.constant 0 : i32
    %2 = arith.cmpi ne, %1, %c0_i32_0 : i32
    scf.if %2 {
      %cst_10 = arith.constant 0.000000e+00 : f32
      %12 = vector.broadcast %cst_10 : f32 to vector<16x96xf32>
      %c0_11 = arith.constant 0 : index
      %c0_12 = arith.constant 0 : index
      %13 = vector.load %arg7[%c0_11, %c0_12] : memref<16x96xf32, #tpu.memory_space<vmem>>, vector<16x96xf32>
      tpu.vector_store %arg7[%c0_11, %c0_12], %12 {strides = array<i32>} : memref<16x96xf32, #tpu.memory_space<vmem>>, vector<16x96xf32>,
    } else {
    }
    %c0 = arith.constant 0 : index
    %c0_1 = arith.constant 0 : index
    %3 = vector.load %arg7[%c0, %c0_1] : memref<16x96xf32, #tpu.memory_space<vmem>>, vector<16x96xf32>
    %c0_2 = arith.constant 0 : index
    %c0_3 = arith.constant 0 : index
    %4 = vector.load %arg3[%c0_2, %c0_3] : memref<16x32xbf16, #tpu.memory_space<vmem>>, vector<16x32xbf16>
    %c0_4 = arith.constant 0 : index
    %c0_5 = arith.constant 0 : index
    %5 = vector.load %arg4[%c0_4, %c0_5] : memref<32x96xbf16, #tpu.memory_space<vmem>>, vector<32x96xbf16>
    %cst = arith.constant dense<0.000000e+00> : vector<16x96xf32>
    %6 = tpu.matmul %4, %5, %cst {dimension_numbers = #tpu.dot_dimension_numbers<[1], [0], [0], [1], [0, 0, 1, 1], [], []>} : vector<16x32xbf16>, vector<32x96xbf16>, vector<16x96xf32> -> vector<16x96xf32>
    %7 = arith.addf %3, %6 : vector<16x96xf32>
    %c0_6 = arith.constant 0 : index
    %c0_7 = arith.constant 0 : index
    %8 = vector.load %arg7[%c0_6, %c0_7] : memref<16x96xf32, #tpu.memory_space<vmem>>, vector<16x96xf32>
    tpu.vector_store %arg7[%c0_6, %c0_7], %7 {strides = array<i32>} : memref<16x96xf32, #tpu.memory_space<vmem>>, vector<16x96xf32>,
    %c0_i32_8 = arith.constant 0 : i32
    %9 = arith.cmpi eq, %arg2, %c0_i32_8 : i32
    %10 = arith.extui %9 : i1 to i32
    %c0_i32_9 = arith.constant 0 : i32
    %11 = arith.cmpi ne, %10, %c0_i32_9 : i32
    scf.if %11 {
      %c0_10 = arith.constant 0 : index
      %c0_11 = arith.constant 0 : index
      %12 = vector.load %arg7[%c0_10, %c0_11] : memref<16x96xf32, #tpu.memory_space<vmem>>, vector<16x96xf32>
      %c0_12 = arith.constant 0 : index
      %c0_13 = arith.constant 0 : index
      %13 = vector.load %arg5[%c0_12, %c0_13] : memref<1x96xf32, #tpu.memory_space<vmem>>, vector<1x96xf32>
      %14 = vector.broadcast %13 : vector<1x96xf32> to vector<16x96xf32>
      %15 = arith.addf %12, %14 : vector<16x96xf32>
      %16 = arith.truncf %15 : vector<16x96xf32> to vector<16x96xbf16>
      %c0_14 = arith.constant 0 : index
      %c0_15 = arith.constant 0 : index
      %17 = vector.load %arg6[%c0_14, %c0_15] : memref<16x96xbf16, #tpu.memory_space<vmem>>, vector<16x96xbf16>
      tpu.vector_store %arg6[%c0_14, %c0_15], %16 {strides = array<i32>} : memref<16x96xbf16, #tpu.memory_space<vmem>>, vector<16x96xbf16>,
    } else {
    }
    return
  }
  func.func @transform_0(%arg0: i32, %arg1: i32, %arg2: i32) -> (i32, i32) {
    %c0_i32 = arith.constant 0 : i32
    return %arg0, %arg2 : i32, i32
  }
  func.func @transform_1(%arg0: i32, %arg1: i32, %arg2: i32) -> (i32, i32) {
    %c0_i32 = arith.constant 0 : i32
    return %arg2, %arg1 : i32, i32
  }
  func.func @transform_2(%arg0: i32, %arg1: i32, %arg2: i32) -> (i32, i32) {
    %c0_i32 = arith.constant 0 : i32
    %c0_i32_0 = arith.constant 0 : i32
    return %c0_i32, %arg1 : i32, i32
  }
  func.func @transform_3(%arg0: i32, %arg1: i32, %arg2: i32) -> (i32, i32) {
    %c0_i32 = arith.constant 0 : i32
    return %arg0, %arg1 : i32, i32
  }
}

</mosaic_0001>

<bundles_post_ra>
// kernel: tpu_custom_call.1
= control target key start
LH: loop header
LB: loop body
LE: loop exit
PB: predicated region body
PF: predicated region fallthrough
CT: control target
= control target key end

     0   :  { %8 = vsyncpa [#allocation4], 0  ;;  %s291_s0 = inlined_call_operand.hbm [shape: bf16[16,32], index: 0, kind: input, shape index: {}]   ;;  %s292_s1 = inlined_call_operand.hbm [shape: bf16[32,96], index: 1, kind: input, shape index: {}]   ;;  %s293_s2 = inlined_call_operand.vmem [shape: f32[1,96], index: 2, kind: input, shape index: {}]   ;;  %s294_s3 = inlined_call_operand.hbm [shape: bf16[16,96], index: 3, kind: output, shape index: {}]  }
   0x1   :  { %9 = vsyncpa [#allocation7], 0 }
   0x2   :  { %10 = vsyncpa [#allocation5], 0  ;;  %s15_s14 = sshll.u32 %s291_s0, 4  ;;  %s240_s15 = smov [#allocation3]   ;;  %s16_s14 = int_to_ptr.hbm [resolvable:$true] %s15_s14 }
   0x3   :  { %s17_s16 = sshll.u32 %s240_s15, 4  ;;  %s28_s19 = sshll.u32 %s292_s1, 4  ;;  %s18_s16 = int_to_ptr.vmem [resolvable:$true] %s17_s16  ;;  %s29_s19 = int_to_ptr.hbm [resolvable:$true] %s28_s19 }
   0x4   :  { %s241_s20 = smov 64   ;;  %s242_s21 = smov 4  }
   0x5   :  { %23 = dma.hbm_to_vmem [thread:$0]  %s16_s14, 128, %s18_s16, [#allocation4], %s241_s20, %s241_s20, %s242_s21  }
   0x6   :  { %s243_s22 = smov [#allocation6]  }
   0x7   :  { %s30_s23 = sshll.u32 %s243_s22, 4  ;;  %s31_s23 = int_to_ptr.vmem [resolvable:$true] %s30_s23 }
   0x8   :  { %36 = dma.hbm_to_vmem [thread:$0]  %s29_s19, 256, %s31_s23, [#allocation7], %s241_s20, %s241_s20, %s242_s21  }
   0x9   :  { %234 = dma.done.wait [#allocation4], 128  }
   0xa   :  { %235 = vsyncadd [#allocation4], 4294967168 }
   0xb   :  { %236 = dma.done.wait [#allocation7], 256  }
   0xc   :  { %237 = vsyncadd [#allocation7], 4294967040  ;;  %vm52_vm0 = vcmask 785408   ;;  %v244_v0 = vmov 0.0   ;;  %v154_v1 = vld [vmem:[#allocation6 + $0x8] sm:$0xff]  ;;  %v153_v2 = vld [vmem:[#allocation6] sm:$0xff] }
   0xd   :  { %53 = vst.msk [vmem:[#allocation2] sm:$0xff] %vm52_vm0, %v244_v0  ;;  %90 = vmatpush.bf16.msra.mxu0 %v154_v1  ;;  %v152_v3 = vld [vmem:[#allocation3] sm:$0xff]  ;;  %vm80_vm1 = vcmask 261120   ;;  %v161_v8 = vld [vmem:[%s293_s2] ss:$0 sm:$0xff]  ;;  %vm116_vm2 = vcmask 781312  }
   0xe   :  { %54 = vst.msk [vmem:[#allocation2 + $0x8] sm:$0xff] %vm52_vm0, %v244_v0  ;;  %s245_s24 = smov [#allocation8]   ;;  %s125_s28 = sshll.u32 %s294_s3, 4  ;;  %s126_s28 = int_to_ptr.hbm [resolvable:$true] %s125_s28 }
   0xf   :  { %s123_s25 = sshll.u32 %s245_s24, 4  ;;  %s124_s25 = int_to_ptr.vmem [resolvable:$true] %s123_s25 }
  0x11   :  { %91 = vmatpush.bf16.msra.mxu0 %v153_v2 }
  0x14   :  { %151 = vmatmul.msk.bf16.vlgmr.msra.gmra.mxu0 %vm80_vm1, %v152_v3  ;;  %v55_v4 = vld [vmem:[#allocation2] sm:$0xff] }
  0x15   :  { %v56_v7 = vld [vmem:[#allocation2 + $0x8] sm:$0xff] }
  0x91   :  { %v93_v5 = vpop.f32.mrf.mxu0 }
  0x92   :  { %v98_v6 = vadd.f32 %v93_v5, %v55_v4 }
  0x94   :  { %101 = vst.msk [vmem:[#allocation2] sm:$0xff] %vm52_vm0, %v98_v6 }
  0x99   :  { %v95_v9 = vpop.f32.mrf.mxu0 }
  0x9a   :  { %v99_v10 = vadd.f32 %v95_v9, %v56_v7 }
  0x9b   :  { %v106_v11 = vld [vmem:[#allocation2] sm:$0xff] }
  0x9c   :  { %102 = vst.msk [vmem:[#allocation2 + $0x8] sm:$0xff] %vm52_vm0, %v99_v10  ;;  %v112_v12 = vadd.f32 %v161_v8, %v106_v11 }
  0x9e   :  { %v114_v13 = vpack.c.bf16 %v112_v12, %v112_v12 }
  0xa0   :  { %117 = vst.msk [vmem:[#allocation8] sm:$0xf] %vm116_vm2, %v114_v13 }
  0xa3   :  { %v107_v14 = vld [vmem:[#allocation2 + $0x8] sm:$0xff] }
  0xa4   :  { %v113_v15 = vadd.f32 %v161_v8, %v107_v14 }
  0xa6   :  { %v115_v16 = vpack.c.bf16 %v113_v15, %v113_v15 }
  0xa8   :  { %118 = vst.msk [vmem:[#allocation8 + $0x4] sm:$0xf] %vm116_vm2, %v115_v16 }
  0xa9   :  { %131 = dma.vmem_to_hbm [thread:$0]  %s124_s25, 128, %s126_s28, [#allocation5], %s241_s20, %s241_s20, %s242_s21  }
  0xaa   :  { %238 = dma.done.wait [#allocation5], 128  }
  0xab   :  { %239 = vsyncadd [#allocation5], 4294967168 }
  0xac   :  { %136 = vsyncpa [#allocation4], 1 }
  0xad   :  { %137 = vsyncpa [#allocation7], 1 }
  0xae   :  { %138 = vsyncpa [#allocation5], 1 }

</bundles_post_ra>
